<compile_context>
chip_gen: v5e
topology: v5e:2x2
jax: 0.10.0
libtpu: 0.0.40
codegen_flags: <defaults>
</compile_context>

<pallas_src>
import functools

import jax
import jax.numpy as jnp
from jax import lax
from jax.experimental import pallas as pl
from jax.experimental.pallas import tpu as pltpu

_LANES = 128


def _round_up(x, m):
    return ((x + m - 1) // m) * m


def _tpu_defaults(itemsize):
    """Generation-aware (tile_rows, num_chunks, vmem_limit_bytes)."""
    tile_rows, num_chunks, vmem_limit = 4096, 1, None
    try:
        kind = jax.devices()[0].device_kind.lower()
    except Exception:  # pragma: no cover - defensive, fall back to v5e/v6e defaults
        kind = ""
    if "v7" in kind:
        # 2 TensorCores/chip, ~3.2 TB/s HBM, 64 MiB physical VMEM: bigger
        # tiles to amortize the ~0.35us/step overhead, explicit scoped-VMEM
        # limit, and shard the leading grid axis across both cores.
        tile_rows, num_chunks, vmem_limit = 8192, 2, 48 * 1024 * 1024
    # v5e: 4096 f32 rows -> 2 MiB/block, 2 inputs x 2 buffers = 8 MiB, well
    # under the 16 MiB scoped default.  v6e: same tile is ~86%+ of roofline.
    tile_rows *= max(1, 4 // max(1, int(itemsize)))
    return tile_rows, num_chunks, vmem_limit


def _pearson_stats_kernel(x_ref, y_ref, o_ref, *, tile_rows, row_unit,
                          tiles_per_chunk, rows, ragged):
    """Accumulate Pearson sufficient statistics for one grid step.

    x_ref, y_ref: (tile_rows, 128) input tiles in their native dtype.
    o_ref:        (1, 5, row_unit, 128) f32 partial statistics, resident
                  across the trailing (reduction) grid axis:
                  [sum_x, sum_y, sum_xy, sum_xx, sum_yy] folded
                  mod (row_unit, 128).
    """
    t = pl.program_id(1)

    @pl.when(t == 0)
    def _init():
        o_ref[...] = jnp.zeros_like(o_ref)

    n_steps = tile_rows // row_unit
    unroll = max(1, min(8, n_steps))

    def fold(valid_rows):
        # valid_rows is None for a fully valid tile, otherwise a traced
        # scalar count of valid rows (only the last, partial tile).
        zeros = jnp.zeros((row_unit, _LANES), jnp.float32)
        if valid_rows is not None:
            base_rid = lax.broadcasted_iota(jnp.int32, (row_unit, _LANES), 0)

        def body(s, carry):
            sx, sy, sxy, sxx, syy = carry
            off = pl.multiple_of(s * row_unit, row_unit)
            # One VMEM load per input sub-tile; cast + all five statistic
            # updates happen while the data is live in registers.
            x = x_ref[pl.ds(off, row_unit), :].astype(jnp.float32)
            y = y_ref[pl.ds(off, row_unit), :].astype(jnp.float32)
            if valid_rows is not None:
                m = (base_rid + off) < valid_rows
                x = jnp.where(m, x, 0.0)
                y = jnp.where(m, y, 0.0)
            return (sx + x, sy + y, sxy + x * y, sxx + x * x, syy + y * y)

        sx, sy, sxy, sxx, syy = lax.fori_loop(
            0, n_steps, body, (zeros, zeros, zeros, zeros, zeros),
            unroll=unroll)
        o_ref[0, 0] += sx
        o_ref[0, 1] += sy
        o_ref[0, 2] += sxy
        o_ref[0, 3] += sxx
        o_ref[0, 4] += syy

    if not ragged:
        fold(None)
    else:
        c = pl.program_id(0)
        ti = c * tiles_per_chunk + t
        rem = rows - ti * tile_rows   # valid rows left at this tile's start

        @pl.when(rem >= tile_rows)
        def _full_tile():
            fold(None)

        @pl.when(jnp.logical_and(rem > 0, rem < tile_rows))
        def _partial_tile():
            fold(rem)
        # rem <= 0: tile is fully out of range -> contributes nothing.


def map_pearson(preds, labels, *, tile_rows=None, num_chunks=None):
    """Pallas implementation of MapPearson.forward (mode == 0)."""
    assert preds.shape == labels.shape
    n_total = int(preds.size)
    lanes = _LANES

    isz_x = jnp.dtype(preds.dtype).itemsize
    isz_y = jnp.dtype(labels.dtype).itemsize
    min_isz = max(1, min(isz_x, isz_y))
    # Native sublane packing: 8 rows for 4-byte, 16 for 2-byte, 32 for 1-byte.
    row_unit = 8 * max(1, 4 // min_isz)

    auto_tile, auto_chunks, vmem_limit = _tpu_defaults(min_isz)
    if tile_rows is None:
        tile_rows = auto_tile
    if num_chunks is None:
        num_chunks = auto_chunks

    # Flatten (row-major == torch.flatten on contiguous NCHW).
    xf = preds.reshape(-1)
    yf = labels.reshape(-1)

    rows = n_total // lanes
    main_n = rows * lanes
    tail = n_total - main_n

    # <128-element flat remainder: tiny jnp reduction in the wrapper (no
    # full-array pad just to make the size lane-divisible).
    tail_stats = None
    if tail:
        xt = xf[main_n:].astype(jnp.float32)
        yt = yf[main_n:].astype(jnp.float32)
        tail_stats = jnp.stack(
            [xt.sum(), yt.sum(), (xt * yt).sum(), (xt * xt).sum(), (yt * yt).sum()])

    if rows == 0:
        tot = tail_stats
    else:
        x2d = (xf[:main_n] if tail else xf).reshape(rows, lanes)
        y2d = (yf[:main_n] if tail else yf).reshape(rows, lanes)

        tile_rows = max(row_unit, _round_up(int(tile_rows), row_unit))
        tile_rows_eff = min(tile_rows, _round_up(rows, row_unit))
        num_tiles = -(-rows // tile_rows_eff)
        chunks = max(1, min(int(num_chunks), num_tiles))
        tpc = -(-num_tiles // chunks)

        has_partial = (rows % tile_rows_eff) != 0   # last tile partially valid
        has_oob = chunks * tpc > num_tiles          # some tiles fully out of range
        ragged = has_partial or has_oob

        if has_oob:
            last = num_tiles - 1
            in_map = lambda c, t: (jnp.minimum(c * tpc + t, last), 0)
        else:
            in_map = lambda c, t: (c * tpc + t, 0)

        kernel = functools.partial(
            _pearson_stats_kernel,
            tile_rows=tile_rows_eff, row_unit=row_unit,
            tiles_per_chunk=tpc, rows=rows, ragged=ragged)

        out_bytes = chunks * 5 * row_unit * lanes * 4
        cost = pl.CostEstimate(
            flops=8 * main_n, transcendentals=0,
            bytes_accessed=main_n * (isz_x + isz_y) + out_bytes)

        cp_kwargs = dict(dimension_semantics=(
            "parallel" if chunks > 1 else "arbitrary", "arbitrary"))
        if vmem_limit is not None:
            cp_kwargs["vmem_limit_bytes"] = int(vmem_limit)

        stats = pl.pallas_call(
            kernel,
            out_shape=jax.ShapeDtypeStruct((chunks, 5, row_unit, lanes), jnp.float32),
            grid_spec=pltpu.PrefetchScalarGridSpec(
                num_scalar_prefetch=0,
                grid=(chunks, tpc),
                in_specs=[pl.BlockSpec((tile_rows_eff, lanes), in_map),
                          pl.BlockSpec((tile_rows_eff, lanes), in_map)],
                out_specs=pl.BlockSpec((1, 5, row_unit, lanes),
                                       lambda c, t: (c, 0, 0, 0)),
            ),
            compiler_params=pltpu.CompilerParams(**cp_kwargs),
            cost_estimate=cost,
        )(x2d, y2d)

        tot = jnp.sum(stats, axis=(0, 2, 3))  # (5,)
        if tail_stats is not None:
            tot = tot + tail_stats

    sx, sy, sxy, sxx, syy = tot[0], tot[1], tot[2], tot[3], tot[4]
    n = jnp.float32(n_total)
    # Single-pass corrcoef.  Like torch.corrcoef, zero-variance inputs yield
    # nan/inf; f32 cancellation can matter if |mean| >> std.
    cov = sxy - sx * sy / n
    vx = sxx - sx * sx / n
    vy = syy - sy * sy / n
    r = cov * lax.rsqrt(vx * vy)
    return jnp.float32(1.0) - r


def _reference(preds, labels):
    xf = preds.reshape(-1).astype(jnp.float32)
    yf = labels.reshape(-1).astype(jnp.float32)
    r = jnp.corrcoef(jnp.stack([xf, yf], axis=0))[0, 1]
    return 1.0 - r


if __name__ == "__main__":
    key = jax.random.PRNGKey(0)
    k1, k2, k3, k4 = jax.random.split(key, 4)

    # Test 1: NCHW batch=2, channels=4, spatial=16x16 (single full tile).
    preds = jax.random.normal(k1, (2, 4, 16, 16), dtype=jnp.float32)
    labels = 0.7 * preds + 0.3 * jax.random.normal(
        k2, (2, 4, 16, 16), dtype=jnp.float32)
    loss = jax.block_until_ready(map_pearson(preds, labels))
    ref = _reference(preds, labels)
    assert jnp.allclose(loss, ref, atol=1e-5, rtol=1e-5), (loss, ref)

    # Test 2: multi-tile + two parallel chunks with a small forced tile.
    p2 = jax.random.normal(k3, (2, 4, 32, 32), dtype=jnp.float32)
    l2 = 0.5 * p2 + 0.5 * jax.random.normal(k4, (2, 4, 32, 32), dtype=jnp.float32)
    loss2 = jax.block_until_ready(map_pearson(p2, l2, tile_rows=8, num_chunks=2))
    ref2 = _reference(p2, l2)
    assert jnp.allclose(loss2, ref2, atol=1e-5, rtol=1e-5), (loss2, ref2)

    # Test 3: ragged element count (in-kernel row mask + <128-elem wrapper tail).
    p3 = jax.random.normal(k1, (3, 3, 10, 10), dtype=jnp.float32)
    l3 = 0.6 * p3 + 0.4 * jax.random.normal(k2, (3, 3, 10, 10), dtype=jnp.float32)
    loss3 = jax.block_until_ready(map_pearson(p3, l3))
    ref3 = _reference(p3, l3)
    assert jnp.allclose(loss3, ref3, atol=1e-5, rtol=1e-5), (loss3, ref3)

    # Test 4: partial last tile + a fully out-of-range tile under 2 chunks
    # (exercises the clamped index map and the rem<=0 skip path).
    p4 = jax.random.normal(k3, (1, 1, 40, 128), dtype=jnp.float32)
    l4 = 0.4 * p4 + 0.6 * jax.random.normal(k4, (1, 1, 40, 128), dtype=jnp.float32)
    loss4 = jax.block_until_ready(map_pearson(p4, l4, tile_rows=16, num_chunks=2))
    ref4 = _reference(p4, l4)
    assert jnp.allclose(loss4, ref4, atol=1e-5, rtol=1e-5), (loss4, ref4)

    # Test 5: bf16 inputs (native-dtype DMA, 16-row sublane packing).
    p5 = jax.random.normal(k1, (2, 4, 16, 16), dtype=jnp.float32).astype(jnp.bfloat16)
    l5 = (0.7 * p5.astype(jnp.float32)
          + 0.3 * jax.random.normal(k2, (2, 4, 16, 16), dtype=jnp.float32)
          ).astype(jnp.bfloat16)
    loss5 = jax.block_until_ready(map_pearson(p5, l5))
    ref5 = _reference(p5, l5)
    assert jnp.allclose(loss5, ref5, atol=1e-4, rtol=1e-4), (loss5, ref5)

    # TODO(synk): mode==1 (per-row corrcoef loop) is dead code in the PyTorch
    # forward (mode hard-coded to 0) and is not implemented here.
    print("KERNEL_OK")
</pallas_src>

<mosaic_0001>
module attributes {stable_mosaic.version = 11 : i64} {
  func.func @_pearson_stats_kernel(%arg0: i32, %arg1: i32, %arg2: memref<16x128xf32, #tpu.memory_space<vmem>>, %arg3: memref<16x128xf32, #tpu.memory_space<vmem>>, %arg4: memref<1x5x8x128xf32, #tpu.memory_space<vmem>>) attributes {dimension_semantics = [#tpu.dimension_semantics<arbitrary>, #tpu.dimension_semantics<arbitrary>], iteration_bounds = array<i64: 1, 1>, scalar_prefetch = 0 : i64, scratch_operands = 0 : i64, tpu.core_type = #tpu.core_type<tc>, window_params = [{transform_indices = @transform_0, window_bounds = array<i64: 16, 128>}, {transform_indices = @transform_1, window_bounds = array<i64: 16, 128>}, {transform_indices = @transform_2, window_bounds = array<i64: 1, 5, 8, 128>}]} {
    %c0_i32 = arith.constant 0 : i32
    %0 = arith.cmpi eq, %arg1, %c0_i32 : i32
    %1 = arith.extui %0 : i1 to i32
    %c0_i32_0 = arith.constant 0 : i32
    %2 = arith.cmpi ne, %1, %c0_i32_0 : i32
    scf.if %2 {
      %cst_42 = arith.constant 0.000000e+00 : f32
      %62 = vector.broadcast %cst_42 : f32 to vector<1x5x8x128xf32>
      %c0_43 = arith.constant 0 : index
      %c0_44 = arith.constant 0 : index
      %c0_45 = arith.constant 0 : index
      %c0_46 = arith.constant 0 : index
      %63 = vector.load %arg4[%c0_43, %c0_44, %c0_45, %c0_46] : memref<1x5x8x128xf32, #tpu.memory_space<vmem>>, vector<1x5x8x128xf32>
      tpu.vector_store %arg4[%c0_43, %c0_44, %c0_45, %c0_46], %62 {strides = array<i32>} : memref<1x5x8x128xf32, #tpu.memory_space<vmem>>, vector<1x5x8x128xf32>,
    } else {
    }
    %cst = arith.constant 0.000000e+00 : f32
    %3 = vector.broadcast %cst : f32 to vector<8x128xf32>
    %c0_i32_1 = arith.constant 0 : i32
    %c8_i32 = arith.constant 8 : i32
    %4 = arith.muli %c0_i32_1, %c8_i32 : i32
    %5 = tpu.assume_multiple %4, 8 : i32
    %6 = arith.index_cast %5 : i32 to index
    %c0 = arith.constant 0 : index
    %7 = vector.load %arg2[%6, %c0] : memref<16x128xf32, #tpu.memory_space<vmem>>, vector<8x128xf32>
    %8 = arith.index_cast %5 : i32 to index
    %c0_2 = arith.constant 0 : index
    %9 = vector.load %arg3[%8, %c0_2] : memref<16x128xf32, #tpu.memory_space<vmem>>, vector<8x128xf32>
    %10 = arith.addf %3, %7 : vector<8x128xf32>
    %11 = arith.addf %3, %9 : vector<8x128xf32>
    %12 = arith.mulf %7, %9 : vector<8x128xf32>
    %13 = arith.addf %3, %12 : vector<8x128xf32>
    %14 = arith.mulf %7, %7 : vector<8x128xf32>
    %15 = arith.addf %3, %14 : vector<8x128xf32>
    %16 = arith.mulf %9, %9 : vector<8x128xf32>
    %17 = arith.addf %3, %16 : vector<8x128xf32>
    %c1_i32 = arith.constant 1 : i32
    %c8_i32_3 = arith.constant 8 : i32
    %18 = arith.muli %c1_i32, %c8_i32_3 : i32
    %19 = tpu.assume_multiple %18, 8 : i32
    %20 = arith.index_cast %19 : i32 to index
    %c0_4 = arith.constant 0 : index
    %21 = vector.load %arg2[%20, %c0_4] : memref<16x128xf32, #tpu.memory_space<vmem>>, vector<8x128xf32>
    %22 = arith.index_cast %19 : i32 to index
    %c0_5 = arith.constant 0 : index
    %23 = vector.load %arg3[%22, %c0_5] : memref<16x128xf32, #tpu.memory_space<vmem>>, vector<8x128xf32>
    %24 = arith.addf %10, %21 : vector<8x128xf32>
    %25 = arith.addf %11, %23 : vector<8x128xf32>
    %26 = arith.mulf %21, %23 : vector<8x128xf32>
    %27 = arith.addf %13, %26 : vector<8x128xf32>
    %28 = arith.mulf %21, %21 : vector<8x128xf32>
    %29 = arith.addf %15, %28 : vector<8x128xf32>
    %30 = arith.mulf %23, %23 : vector<8x128xf32>
    %31 = arith.addf %17, %30 : vector<8x128xf32>
    %c2_i32 = arith.constant 2 : i32
    %c0_6 = arith.constant 0 : index
    %c0_7 = arith.constant 0 : index
    %c0_8 = arith.constant 0 : index
    %c0_9 = arith.constant 0 : index
    %32 = vector.load %arg4[%c0_6, %c0_7, %c0_8, %c0_9] : memref<1x5x8x128xf32, #tpu.memory_space<vmem>>, vector<1x1x8x128xf32>
    %33 = vector.shape_cast %32 : vector<1x1x8x128xf32> to vector<8x128xf32>
    %34 = arith.addf %33, %24 : vector<8x128xf32>
    %c0_10 = arith.constant 0 : index
    %c0_11 = arith.constant 0 : index
    %c0_12 = arith.constant 0 : index
    %c0_13 = arith.constant 0 : index
    %35 = vector.load %arg4[%c0_10, %c0_11, %c0_12, %c0_13] : memref<1x5x8x128xf32, #tpu.memory_space<vmem>>, vector<1x1x8x128xf32>
    %36 = vector.shape_cast %35 : vector<1x1x8x128xf32> to vector<8x128xf32>
    %37 = vector.shape_cast %34 : vector<8x128xf32> to vector<1x1x8x128xf32>
    tpu.vector_store %arg4[%c0_10, %c0_11, %c0_12, %c0_13], %37 {strides = array<i32>} : memref<1x5x8x128xf32, #tpu.memory_space<vmem>>, vector<1x1x8x128xf32>,
    %c0_14 = arith.constant 0 : index
    %c1 = arith.constant 1 : index
    %c0_15 = arith.constant 0 : index
    %c0_16 = arith.constant 0 : index
    %38 = vector.load %arg4[%c0_14, %c1, %c0_15, %c0_16] : memref<1x5x8x128xf32, #tpu.memory_space<vmem>>, vector<1x1x8x128xf32>
    %39 = vector.shape_cast %38 : vector<1x1x8x128xf32> to vector<8x128xf32>
    %40 = arith.addf %39, %25 : vector<8x128xf32>
    %c0_17 = arith.constant 0 : index
    %c1_18 = arith.constant 1 : index
    %c0_19 = arith.constant 0 : index
    %c0_20 = arith.constant 0 : index
    %41 = vector.load %arg4[%c0_17, %c1_18, %c0_19, %c0_20] : memref<1x5x8x128xf32, #tpu.memory_space<vmem>>, vector<1x1x8x128xf32>
    %42 = vector.shape_cast %41 : vector<1x1x8x128xf32> to vector<8x128xf32>
    %43 = vector.shape_cast %40 : vector<8x128xf32> to vector<1x1x8x128xf32>
    tpu.vector_store %arg4[%c0_17, %c1_18, %c0_19, %c0_20], %43 {strides = array<i32>} : memref<1x5x8x128xf32, #tpu.memory_space<vmem>>, vector<1x1x8x128xf32>,
    %c0_21 = arith.constant 0 : index
    %c2 = arith.constant 2 : index
    %c0_22 = arith.constant 0 : index
    %c0_23 = arith.constant 0 : index
    %44 = vector.load %arg4[%c0_21, %c2, %c0_22, %c0_23] : memref<1x5x8x128xf32, #tpu.memory_space<vmem>>, vector<1x1x8x128xf32>
    %45 = vector.shape_cast %44 : vector<1x1x8x128xf32> to vector<8x128xf32>
    %46 = arith.addf %45, %27 : vector<8x128xf32>
    %c0_24 = arith.constant 0 : index
    %c2_25 = arith.constant 2 : index
    %c0_26 = arith.constant 0 : index
    %c0_27 = arith.constant 0 : index
    %47 = vector.load %arg4[%c0_24, %c2_25, %c0_26, %c0_27] : memref<1x5x8x128xf32, #tpu.memory_space<vmem>>, vector<1x1x8x128xf32>
    %48 = vector.shape_cast %47 : vector<1x1x8x128xf32> to vector<8x128xf32>
    %49 = vector.shape_cast %46 : vector<8x128xf32> to vector<1x1x8x128xf32>
    tpu.vector_store %arg4[%c0_24, %c2_25, %c0_26, %c0_27], %49 {strides = array<i32>} : memref<1x5x8x128xf32, #tpu.memory_space<vmem>>, vector<1x1x8x128xf32>,
    %c0_28 = arith.constant 0 : index
    %c3 = arith.constant 3 : index
    %c0_29 = arith.constant 0 : index
    %c0_30 = arith.constant 0 : index
    %50 = vector.load %arg4[%c0_28, %c3, %c0_29, %c0_30] : memref<1x5x8x128xf32, #tpu.memory_space<vmem>>, vector<1x1x8x128xf32>
    %51 = vector.shape_cast %50 : vector<1x1x8x128xf32> to vector<8x128xf32>
    %52 = arith.addf %51, %29 : vector<8x128xf32>
    %c0_31 = arith.constant 0 : index
    %c3_32 = arith.constant 3 : index
    %c0_33 = arith.constant 0 : index
    %c0_34 = arith.constant 0 : index
    %53 = vector.load %arg4[%c0_31, %c3_32, %c0_33, %c0_34] : memref<1x5x8x128xf32, #tpu.memory_space<vmem>>, vector<1x1x8x128xf32>
    %54 = vector.shape_cast %53 : vector<1x1x8x128xf32> to vector<8x128xf32>
    %55 = vector.shape_cast %52 : vector<8x128xf32> to vector<1x1x8x128xf32>
    tpu.vector_store %arg4[%c0_31, %c3_32, %c0_33, %c0_34], %55 {strides = array<i32>} : memref<1x5x8x128xf32, #tpu.memory_space<vmem>>, vector<1x1x8x128xf32>,
    %c0_35 = arith.constant 0 : index
    %c4 = arith.constant 4 : index
    %c0_36 = arith.constant 0 : index
    %c0_37 = arith.constant 0 : index
    %56 = vector.load %arg4[%c0_35, %c4, %c0_36, %c0_37] : memref<1x5x8x128xf32, #tpu.memory_space<vmem>>, vector<1x1x8x128xf32>
    %57 = vector.shape_cast %56 : vector<1x1x8x128xf32> to vector<8x128xf32>
    %58 = arith.addf %57, %31 : vector<8x128xf32>
    %c0_38 = arith.constant 0 : index
    %c4_39 = arith.constant 4 : index
    %c0_40 = arith.constant 0 : index
    %c0_41 = arith.constant 0 : index
    %59 = vector.load %arg4[%c0_38, %c4_39, %c0_40, %c0_41] : memref<1x5x8x128xf32, #tpu.memory_space<vmem>>, vector<1x1x8x128xf32>
    %60 = vector.shape_cast %59 : vector<1x1x8x128xf32> to vector<8x128xf32>
    %61 = vector.shape_cast %58 : vector<8x128xf32> to vector<1x1x8x128xf32>
    tpu.vector_store %arg4[%c0_38, %c4_39, %c0_40, %c0_41], %61 {strides = array<i32>} : memref<1x5x8x128xf32, #tpu.memory_space<vmem>>, vector<1x1x8x128xf32>,
    return
  }
  func.func @transform_0(%arg0: i32, %arg1: i32) -> (i32, i32) {
    %c1_i32 = arith.constant 1 : i32
    %0 = arith.muli %arg0, %c1_i32 : i32
    %1 = arith.addi %0, %arg1 : i32
    %c0_i32 = arith.constant 0 : i32
    %c0_i32_0 = arith.constant 0 : i32
    return %1, %c0_i32 : i32, i32
  }
  func.func @transform_1(%arg0: i32, %arg1: i32) -> (i32, i32) {
    %c1_i32 = arith.constant 1 : i32
    %0 = arith.muli %arg0, %c1_i32 : i32
    %1 = arith.addi %0, %arg1 : i32
    %c0_i32 = arith.constant 0 : i32
    %c0_i32_0 = arith.constant 0 : i32
    return %1, %c0_i32 : i32, i32
  }
  func.func @transform_2(%arg0: i32, %arg1: i32) -> (i32, i32, i32, i32) {
    %c0_i32 = arith.constant 0 : i32
    %c0_i32_0 = arith.constant 0 : i32
    %c0_i32_1 = arith.constant 0 : i32
    %c0_i32_2 = arith.constant 0 : i32
    return %arg0, %c0_i32, %c0_i32_0, %c0_i32_1 : i32, i32, i32, i32
  }
}

</mosaic_0001>

<bundles_post_ra>
// kernel: tpu_custom_call.1
= control target key start
LH: loop header
LB: loop body
LE: loop exit
PB: predicated region body
PF: predicated region fallthrough
CT: control target
= control target key end

     0   :  { %7 = vsyncpa [#allocation3], 0  ;;  %s248_s0 = inlined_call_operand.hbm [shape: f32[16,128], index: 0, kind: input, shape index: {}]   ;;  %s249_s1 = inlined_call_operand.hbm [shape: f32[16,128], index: 1, kind: input, shape index: {}]   ;;  %s250_s2 = inlined_call_operand.hbm [shape: f32[1,5,8,128], index: 2, kind: output, shape index: {}]  }
   0x1   :  { %8 = vsyncpa [#allocation6], 0 }
   0x2   :  { %9 = vsyncpa [#allocation4], 0  ;;  %s18_s11 = sshll.u32 %s248_s0, 4  ;;  %s210_s12 = smov [#allocation2]   ;;  %s19_s11 = int_to_ptr.hbm [resolvable:$true] %s18_s11 }
   0x3   :  { %s20_s13 = sshll.u32 %s210_s12, 4  ;;  %s35_s16 = sshll.u32 %s249_s1, 4  ;;  %s21_s13 = int_to_ptr.vmem [resolvable:$true] %s20_s13  ;;  %s36_s16 = int_to_ptr.hbm [resolvable:$true] %s35_s16 }
   0x4   :  { %s211_s17 = smov 128   ;;  %s212_s18 = smov 8  }
   0x5   :  { %26 = dma.hbm_to_vmem [thread:$0]  %s19_s11, 256, %s21_s13, [#allocation3], %s211_s17, %s211_s17, %s212_s18  }
   0x6   :  { %s213_s19 = smov [#allocation5]  }
   0x7   :  { %s37_s20 = sshll.u32 %s213_s19, 4  ;;  %s38_s20 = int_to_ptr.vmem [resolvable:$true] %s37_s20 }
   0x8   :  { %43 = dma.hbm_to_vmem [thread:$0]  %s36_s16, 256, %s38_s20, [#allocation6], %s211_s17, %s211_s17, %s212_s18  }
   0x9   :  { %204 = dma.done.wait [#allocation3], 256  }
   0xa   :  { %205 = vsyncadd [#allocation3], 4294967040 }
   0xb   :  { %206 = dma.done.wait [#allocation6], 256  }
   0xc   :  { %207 = vsyncadd [#allocation6], 4294967040  ;;  %v65_v0 = vld [vmem:[#allocation2] sm:$0xff]  ;;  %v76_v1 = vld [vmem:[#allocation2 + $0x8] sm:$0xff]  ;;  %s214_s0 = smov [#allocation7]   ;;  %s112_s23 = sshll.u32 %s250_s2, 4  ;;  %s113_s23 = int_to_ptr.hbm [resolvable:$true] %s112_s23 }
   0xd   :  { %v66_v2 = vld [vmem:[#allocation5] sm:$0xff]  ;;  %v79_v3 = vadd.f32 %v76_v1, %v65_v0  ;;  %v78_v4 = vld [vmem:[#allocation5 + $0x8] sm:$0xff]  ;;  %v71_v6 = vmul.f32 %v65_v0, %v65_v0  ;;  %v83_v7 = vmul.f32 %v76_v1, %v76_v1  ;;  %s110_s1 = sshll.u32 %s214_s0, 4  ;;  %s111_s1 = int_to_ptr.vmem [resolvable:$true] %s110_s1 }
   0xe   :  { %v69_v5 = vmul.f32 %v66_v2, %v65_v0  ;;  %v80_v8 = vadd.f32 %v78_v4, %v66_v2  ;;  %v81_v9 = vmul.f32 %v78_v4, %v76_v1  ;;  %v73_v10 = vmul.f32 %v66_v2, %v66_v2 }
   0xf   :  { %v85_v11 = vmul.f32 %v78_v4, %v78_v4  ;;  %v84_v12 = vadd.f32 %v83_v7, %v71_v6  ;;  %89 = vst [vmem:[#allocation7] sm:$0xff] %v79_v3 }
  0x10   :  { %v82_v13 = vadd.f32 %v81_v9, %v69_v5  ;;  %93 = vst [vmem:[#allocation7 + $0x8] sm:$0xff] %v80_v8 }
  0x11   :  { %v86_v14 = vadd.f32 %v85_v11, %v73_v10  ;;  %101 = vst [vmem:[#allocation7 + $0x18] sm:$0xff] %v84_v12 }
  0x12   :  { %97 = vst [vmem:[#allocation7 + $0x10] sm:$0xff] %v82_v13 }
  0x13   :  { %105 = vst [vmem:[#allocation7 + $0x20] sm:$0xff] %v86_v14 }
  0x14   :  { %118 = dma.vmem_to_hbm [thread:$0]  %s111_s1, 640, %s113_s23, [#allocation4], %s211_s17, %s211_s17, %s212_s18  }
  0x15   :  { %208 = dma.done.wait [#allocation4], 640  }
  0x16   :  { %209 = vsyncadd [#allocation4], 4294966656 }
  0x17   :  { %123 = vsyncpa [#allocation3], 1 }
  0x18   :  { %124 = vsyncpa [#allocation6], 1 }
  0x19   :  { %125 = vsyncpa [#allocation4], 1 }

</bundles_post_ra>
